<compile_context>
chip_gen: v6e
topology: v6e:2x2x1
jax: 0.10.0
libtpu: 0.0.40
codegen_flags: <defaults>
</compile_context>

<pallas_src>
import jax
import jax.numpy as jnp
from jax.experimental import pallas as pl
from jax.experimental.pallas import tpu as pltpu


def _round_up(x, m):
    return ((x + m - 1) // m) * m


def _nconv_kernel(x_ref, k_ref, o_ref):
    # x_ref: (tile_b, W*L) f32 row block; k_ref: (W*L, V*L) bf16, resident;
    # o_ref: (tile_b, V*L) f32 row block.
    a = x_ref[...].astype(k_ref.dtype)  # f32 -> bf16 in VMEM (no HBM cost)
    o_ref[...] = jnp.dot(
        a, k_ref[...], preferred_element_type=jnp.float32
    ).astype(o_ref.dtype)


def nconv(x, adj, *, tile_b=512, compute_dtype=jnp.bfloat16):
    """out = einsum('ncwl,vw->ncvl', x, adj).

    x: (N, C, W, L) float32, adj: (V, W).
    Computed as X2(B, W*L) @ kron(adj.T, I_L)(W*L, V*L) with B = N*C, so the
    input/output reshapes are free and no HBM transpose pass is needed.
    """
    N, C, W, L = x.shape
    V, W2 = adj.shape
    assert W == W2, "adj second dim must match x's node dim W"

    B, WL, VL = N * C, W * L, V * L
    out_dtype = x.dtype

    # K[w*L + l, v*L + l'] = adj[v, w] * (l == l')
    k_mat = jnp.kron(adj.T, jnp.eye(L, dtype=adj.dtype)).astype(compute_dtype)

    x2 = x.reshape(B, WL)  # free (contiguous) view

    # --- row (sublane) tiling over B -------------------------------------
    sub = 8  # x / out are f32 in HBM -> 8-row sublane granularity
    Bp = _round_up(B, sub)
    tile = max(sub, min(_round_up(tile_b, sub), Bp))

    # Conservative VMEM working set: double-buffered x/out row blocks plus a
    # (pessimistically double-counted) resident K.
    row_bytes = WL * x.dtype.itemsize + VL * jnp.dtype(out_dtype).itemsize
    k_bytes = WL * VL * jnp.dtype(compute_dtype).itemsize
    budget = 26 * 1024 * 1024
    max_rows = (budget - 2 * k_bytes) // (2 * row_bytes)
    max_rows = max(sub, (max_rows // sub) * sub)
    tile = min(tile, max_rows)

    # v7x shards the "parallel" axis across its 2 TensorCores: keep >= 2 grid
    # steps when that costs no extra padding.
    if Bp // tile < 2 and Bp >= 2 * sub:
        cand = max(sub, ((Bp // 2) // sub) * sub)
        while Bp % cand:
            cand -= sub
        tile = cand

    Bp = _round_up(Bp, tile)
    if Bp != B:
        x2 = jnp.pad(x2, ((0, Bp - B), (0, 0)))

    grid_b = Bp // tile

    flops = 2 * Bp * WL * VL
    bytes_accessed = (Bp * WL + Bp * VL) * x.dtype.itemsize + k_bytes
    vmem_est = 2 * k_bytes + 2 * tile * row_bytes + (4 << 20)
    vmem_limit = int(min(max(vmem_est, 8 << 20), 48 << 20))

    out2 = pl.pallas_call(
        _nconv_kernel,
        out_shape=jax.ShapeDtypeStruct((Bp, VL), out_dtype),
        grid_spec=pltpu.PrefetchScalarGridSpec(
            num_scalar_prefetch=0,
            grid=(grid_b,),
            in_specs=[
                pl.BlockSpec((tile, WL), lambda b: (b, 0)),  # x row block
                pl.BlockSpec((WL, VL), lambda b: (0, 0)),    # K, resident
            ],
            out_specs=pl.BlockSpec((tile, VL), lambda b: (b, 0)),
        ),
        compiler_params=pltpu.CompilerParams(
            dimension_semantics=("parallel",),
            vmem_limit_bytes=vmem_limit,
        ),
        cost_estimate=pl.CostEstimate(
            flops=flops, transcendentals=0, bytes_accessed=bytes_accessed
        ),
    )(x2, k_mat)

    # (Bp, V*L) -> (B, V*L) -> (N, C, V, L): both reshapes are free.
    return out2[:B].reshape(N, C, V, L)


if __name__ == "__main__":
    key = jax.random.PRNGKey(0)
    k1, k2 = jax.random.split(key)

    # Small shapes consistent with MTGNN usage: batch=2, channels=4,
    # num_nodes W=V=16, seq length L=8.
    N, C, W, L = 2, 4, 16, 8
    V = 16

    x = jax.random.normal(k1, (N, C, W, L), dtype=jnp.float32)
    adj = jax.random.normal(k2, (V, W), dtype=jnp.float32)

    out = nconv(x, adj)
    out = jax.block_until_ready(out)

    # correctness check against the einsum semantics (bf16 operands -> f32 acc)
    ref = jnp.einsum("ncwl,vw->ncvl", x, adj)
    assert out.shape == (N, C, V, L)
    assert jnp.allclose(out, ref, atol=5e-2, rtol=5e-2)

    print("KERNEL_OK")
</pallas_src>

<mosaic_0001>
module attributes {stable_mosaic.version = 11 : i64} {
  func.func @_nconv_kernel(%arg0: i32, %arg1: memref<8x128xf32, #tpu.memory_space<vmem>>, %arg2: memref<128x128xbf16, #tpu.memory_space<vmem>>, %arg3: memref<8x128xf32, #tpu.memory_space<vmem>>) attributes {dimension_semantics = [#tpu.dimension_semantics<parallel>], iteration_bounds = array<i64: 1>, scalar_prefetch = 0 : i64, scratch_operands = 0 : i64, tpu.core_type = #tpu.core_type<tc>, window_params = [{transform_indices = @transform_0, window_bounds = array<i64: 8, 128>}, {pipeline_mode = #tpu.pipeline_mode<synchronous>, transform_indices = @transform_1, window_bounds = array<i64: 128, 128>}, {transform_indices = @transform_2, window_bounds = array<i64: 8, 128>}]} {
    %c0 = arith.constant 0 : index
    %c0_0 = arith.constant 0 : index
    %0 = vector.load %arg1[%c0, %c0_0] : memref<8x128xf32, #tpu.memory_space<vmem>>, vector<8x128xf32>
    %1 = arith.truncf %0 : vector<8x128xf32> to vector<8x128xbf16>
    %c0_1 = arith.constant 0 : index
    %c0_2 = arith.constant 0 : index
    %2 = vector.load %arg2[%c0_1, %c0_2] : memref<128x128xbf16, #tpu.memory_space<vmem>>, vector<128x128xbf16>
    %cst = arith.constant dense<0.000000e+00> : vector<8x128xf32>
    %3 = tpu.matmul %1, %2, %cst {dimension_numbers = #tpu.dot_dimension_numbers<[1], [0], [0], [1], [0, 0, 1, 1], [], []>} : vector<8x128xbf16>, vector<128x128xbf16>, vector<8x128xf32> -> vector<8x128xf32>
    %c0_3 = arith.constant 0 : index
    %c0_4 = arith.constant 0 : index
    %4 = vector.load %arg3[%c0_3, %c0_4] : memref<8x128xf32, #tpu.memory_space<vmem>>, vector<8x128xf32>
    tpu.vector_store %arg3[%c0_3, %c0_4], %3 {strides = array<i32>} : memref<8x128xf32, #tpu.memory_space<vmem>>, vector<8x128xf32>,
    return
  }
  func.func @transform_0(%arg0: i32) -> (i32, i32) {
    %c0_i32 = arith.constant 0 : i32
    %c0_i32_0 = arith.constant 0 : i32
    return %arg0, %c0_i32 : i32, i32
  }
  func.func @transform_1(%arg0: i32) -> (i32, i32) {
    %c0_i32 = arith.constant 0 : i32
    %c0_i32_0 = arith.constant 0 : i32
    %c0_i32_1 = arith.constant 0 : i32
    return %c0_i32, %c0_i32_0 : i32, i32
  }
  func.func @transform_2(%arg0: i32) -> (i32, i32) {
    %c0_i32 = arith.constant 0 : i32
    %c0_i32_0 = arith.constant 0 : i32
    return %arg0, %c0_i32 : i32, i32
  }
}

</mosaic_0001>

<bundles_post_ra>
// kernel: tpu_custom_call.1
= control target key start
LH: loop header
LB: loop body
LE: loop exit
PB: predicated region body
PF: predicated region fallthrough
CT: control target
= control target key end

     0   :  { %7 = vsyncpa [#allocation3], 0  ;;  %s311_s0 = inlined_call_operand.hbm [shape: f32[8,128], index: 0, kind: input, shape index: {}]   ;;  %s312_s1 = inlined_call_operand.hbm [shape: bf16[128,128], index: 1, kind: input, shape index: {}]   ;;  %s313_s2 = inlined_call_operand.hbm [shape: f32[8,128], index: 2, kind: output, shape index: {}]  }
   0x1   :  { %8 = vsyncpa [#allocation6], 0 }
   0x2   :  { %9 = vsyncpa [#allocation4], 0  ;;  %s280_s9 = smov [#allocation2]   ;;  %s281_s11 = smov [#allocation5]  }
   0x3   :  { %s16_s10 = sshll.u32 %s280_s9, 4  ;;  %s25_s12 = sshll.u32 %s281_s11, 4  ;;  %s17_s10 = int_to_ptr.vmem [resolvable:$true] %s16_s10  ;;  %s26_s12 = int_to_ptr.vmem [resolvable:$true] %s25_s12 }
   0x4   :  { %s222_s13 = scalar_lea.vmem %s17_s10, 128  ;;  %p227_p1 = scmp.lt.s32.totalorder %s17_s10, %s17_s10 }
   0x5   :  { %p223_p0 = scmp.ne.s32.totalorder %s17_s10, %s222_s13  ;;  %p228_p2 = scmp.lt.s32.totalorder %s222_s13, %s222_s13 }
   0x7   :  { %p229_p3 = por %p228_p2, %p227_p1 }
   0x9   :  { %p230_p4 = pnand %p229_p3, %p223_p0 }
   0xb   :  { %233 = shalt.err (!%p230_p4)
}
   0xc   :  { %19 = dma.hbm_to_vmem [thread:$0]  %s311_s0, 128, %s17_s10, [#allocation3]  }
   0xd   :  { %s242_s16 = scalar_lea.vmem %s26_s12, 1024  ;;  %p247_p6 = scmp.lt.s32.totalorder %s26_s12, %s26_s12 }
   0xe   :  { %p243_p5 = scmp.ne.s32.totalorder %s26_s12, %s242_s16  ;;  %p248_p7 = scmp.lt.s32.totalorder %s242_s16, %s242_s16 }
  0x10   :  { %p249_p8 = por %p248_p7, %p247_p6 }
  0x12   :  { %p250_p9 = pnand %p249_p8, %p243_p5 }
  0x14   :  { %253 = shalt.err (!%p250_p9)
}
  0x15   :  { %s282_s17 = smov 64   ;;  %s283_s18 = smov 4  }
  0x16   :  { %31 = dma.hbm_to_vmem [thread:$0]  %s312_s1, 1024, %s26_s12, [#allocation6], %s282_s17, %s282_s17, %s283_s18  }
  0x17   :  { %274 = dma.done.wait [#allocation3], 128  }
  0x18   :  { %275 = vsyncadd [#allocation3], 4294967168 }
  0x19   :  { %276 = dma.done.wait [#allocation6], 1024  }
  0x1a   :  { %277 = vsyncadd [#allocation6], 4294966272  ;;  %v284_v0 = vmov 0.0   ;;  %vm285_vm0 = vmmov 0   ;;  %v206_v1 = vld [vmem:[#allocation5 + $0x38] sm:$0xff]   ;;  %v207_v2 = vld [vmem:[#allocation5 + $0x30] sm:$0xff]  }
  0x1b   :  { %179 = vmatprep.subr.bf16.mxu0 %v284_v0  ;;  %195 = vmatprep.mubr.msk.bf16.mxu0 %vm285_vm0, %v284_v0  ;;  %v208_v3 = vld [vmem:[#allocation5 + $0x28] sm:$0xff]   ;;  %v209_v4 = vld [vmem:[#allocation5 + $0x20] sm:$0xff]   ;;  %v210_v5 = vld [vmem:[#allocation5 + $0x18] sm:$0xff]   ;;  %s286_s0 = smov [#allocation7]  }
  0x1c   :  { %180 = vmatpush3.bf16.msra.mxu0 %v206_v1  ;;  %v211_v6 = vld [vmem:[#allocation5 + $0x10] sm:$0xff]   ;;  %v212_v7 = vld [vmem:[#allocation5 + $0x8] sm:$0xff]   ;;  %v213_v8 = vld [vmem:[#allocation5] sm:$0xff]   ;;  %s152_s1 = sshll.u32 %s286_s0, 4  ;;  %s153_s1 = int_to_ptr.vmem [resolvable:$true] %s152_s1 }
  0x1d   :  { %181 = vmatprep.subr.bf16.mxu0 %v284_v0  ;;  %v39_v9 = vld [vmem:[#allocation2] sm:$0xff]  ;;  %s254_s21 = scalar_lea.vmem %s153_s1, 128  ;;  %p259_p11 = scmp.lt.s32.totalorder %s153_s1, %s153_s1 }
  0x1e   :  { %v40_v10 = vpack.c.bf16 %v39_v9, %v39_v9  ;;  %p255_p10 = scmp.ne.s32.totalorder %s153_s1, %s254_s21  ;;  %p260_p12 = scmp.lt.s32.totalorder %s254_s21, %s254_s21 }
  0x20   :  { %182 = vmatpush3.bf16.msra.mxu0 %v207_v2  ;;  %p261_p13 = por %p260_p12, %p259_p11 }
  0x21   :  { %183 = vmatprep.subr.bf16.mxu0 %v284_v0 }
  0x22   :  { %p262_p0 = pnand %p261_p13, %p255_p10 }
  0x24   :  { %184 = vmatpush3.bf16.msra.mxu0 %v208_v3 }
  0x25   :  { %185 = vmatprep.subr.bf16.mxu0 %v284_v0 }
  0x28   :  { %186 = vmatpush3.bf16.msra.mxu0 %v209_v4 }
  0x29   :  { %187 = vmatprep.subr.bf16.mxu0 %v284_v0 }
  0x2c   :  { %188 = vmatpush3.bf16.msra.mxu0 %v210_v5 }
  0x2d   :  { %189 = vmatprep.subr.bf16.mxu0 %v284_v0 }
  0x30   :  { %190 = vmatpush3.bf16.msra.mxu0 %v211_v6 }
  0x31   :  { %191 = vmatprep.subr.bf16.mxu0 %v284_v0 }
  0x34   :  { %192 = vmatpush3.bf16.msra.mxu0 %v212_v7 }
  0x35   :  { %193 = vmatprep.subr.bf16.mxu0 %v284_v0 }
  0x38   :  { %194 = vmatpush3.bf16.msra.mxu0 %v213_v8 }
  0x3b   :  { %196 = vmatmul.mubr.bf16.vlgmr.msra.gmra.mxu0 %v40_v10 }
  0xfb   :  { %v139_v11 = vpop.f32.mrf.mxu0 }
  0xfc   :  { %145 = vst [vmem:[#allocation7] sm:$0xff] %v139_v11 }
  0xfd   :  { %v197_v12 = vpop.f32.mrf.mxu0 }
  0xfe   :  { %265 = shalt.err (!%p262_p0)
}
  0xff   :  { %155 = dma.vmem_to_hbm [thread:$0]  %s153_s1, 128, %s313_s2, [#allocation4]   ;;  %v142_v13 = vpop.f32.mrf.mxu0 }
 0x101   :  { %v198_v14 = vpop.f32.mrf.mxu0 }
 0x102   :  { %278 = dma.done.wait [#allocation4], 128  }
 0x103   :  { %279 = vsyncadd [#allocation4], 4294967168 }
 0x104   :  { %159 = vsyncpa [#allocation3], 1 }
 0x105   :  { %160 = vsyncpa [#allocation6], 1 }
 0x106   :  { %161 = vsyncpa [#allocation4], 1 }

</bundles_post_ra>
